<compile_context>
chip_gen: v5e
topology: v5e:2x2
jax: 0.10.0
libtpu: 0.0.40
codegen_flags: <defaults>
</compile_context>

<pallas_src>
import functools

import jax
import jax.numpy as jnp
from jax.experimental import pallas as pl
from jax.experimental.pallas import tpu as pltpu


def _round_up(x, m):
    return ((x + m - 1) // m) * m


def _vmem_budget_bytes():
    """~75% of physical VMEM per core (generation-aware; v7x has only 64 MiB)."""
    try:
        cap = int(pltpu.get_tpu_info().vmem_capacity_bytes)
    except Exception:
        cap = 64 << 20                      # conservative (v7x-sized) fallback
    return max((cap * 3) // 4, 16 << 20)


def _pick_time_tile(t_pad, cap):
    """Largest multiple of 128 <= cap that divides t_pad (t_pad % 128 == 0)."""
    best = 128
    t = 128
    while t <= min(cap, t_pad):
        if t_pad % t == 0:
            best = t
        t += 128
    return best


# --------------------------- stage 1: conv_1x1_in -----------------------------
def _conv_in_kernel(x_ref, w_ref, b_ref, f_ref):
    # x_ref: (1, D, tT) f32 ; w_ref: (F, D) bf16 ; b_ref: (F, 1) f32
    x = x_ref[0].astype(jnp.bfloat16)
    f_ref[0] = (jnp.dot(w_ref[...], x, preferred_element_type=jnp.float32)
                + b_ref[...]).astype(f_ref.dtype)


# ------------------- stage 2: dilated residual stack + conv_out ---------------
def _pg_layers_kernel(f_ref, w_stack_ref, bl_ref, w_out_ref, b_out_ref,
                      out_ref, scr_ref, tap_ref, *, num_layers, off, t_real):
    Fm = f_ref.shape[1]
    t_pad = f_ref.shape[2]
    w_scr = scr_ref.shape[1]
    bf16 = jnp.bfloat16

    # Zero only the halo bands of the shift scratch (Conv1d zero padding) and,
    # once, the time-padding tail; the [off, off+t_real) band is overwritten
    # every layer so it never needs zeroing.
    scr_ref[:, 0:off] = jnp.zeros((Fm, off), bf16)
    scr_ref[:, off + t_pad:w_scr] = jnp.zeros((Fm, w_scr - off - t_pad), bf16)
    if t_pad != t_real:
        scr_ref[:, off + t_real:off + t_pad] = jnp.zeros((Fm, t_pad - t_real), bf16)

    f = f_ref[0]                                     # (Fm, t_pad) f32, resident

    for i in range(num_layers):
        d1 = 2 ** (num_layers - 1 - i)
        d2 = 2 ** i
        f_in = f
        f_b = f.astype(jnp.bfloat16)                 # single bf16 cast per layer
        # Lane-aligned store of the real columns only (pad tail stays zero).
        scr_ref[:, off:off + t_real] = f_b[:, :t_real]

        # Stage the 5 taps of this layer into one stacked (5*Fm, T) bf16 RHS so
        # the whole layer is a single K=5*Fm MXU matmul.
        tap_ref[0 * Fm:1 * Fm, :] = f_b                                    # f[t]
        tap_ref[1 * Fm:2 * Fm, :] = scr_ref[:, off - d1:off - d1 + t_pad]  # f[t-d1]
        tap_ref[2 * Fm:3 * Fm, :] = scr_ref[:, off + d1:off + d1 + t_pad]  # f[t+d1]
        tap_ref[3 * Fm:4 * Fm, :] = scr_ref[:, off - d2:off - d2 + t_pad]  # f[t-d2]
        tap_ref[4 * Fm:5 * Fm, :] = scr_ref[:, off + d2:off + d2 + t_pad]  # f[t+d2]

        fused = (jnp.dot(w_stack_ref[i], tap_ref[...],
                         preferred_element_type=jnp.float32) + bl_ref[i])
        # ReLU + (dropout == identity at inference) + residual, fused in f32:
        # one (Fm, T) writeback of `f` per layer.
        f = jnp.maximum(fused, 0.0) + f_in

    out = (jnp.dot(w_out_ref[...], f.astype(jnp.bfloat16),
                   preferred_element_type=jnp.float32) + b_out_ref[...])
    out_ref[0] = out.astype(out_ref.dtype)


# --------------------------------- wrapper ------------------------------------
def prediction_generation(x_ncw, params, *, num_layers, time_tile=512):
    """x_ncw: (N, dim, T) float32 (PyTorch NCW). Returns (N, num_classes, T)."""
    (w_in, b_in, wd1, bd1, wd2, bd2, wf, bf_, w_out, b_out) = params
    N, D, T = x_ncw.shape
    Fm = w_in.shape[0]
    C = w_out.shape[0]
    L = num_layers
    x = x_ncw.astype(jnp.float32)

    # ---- pad T to a multiple of 128 (and of the stage-1 time tile) -----------
    T_pad = _round_up(T, 128)
    cap = max(128, (int(time_tile) // 128) * 128)
    tT = _pick_time_tile(T_pad, cap)
    if T_pad != T:
        x = jnp.pad(x, ((0, 0), (0, 0), (0, T_pad - T)))
    nT = T_pad // tT

    # ---- fold conv_fusion (1x1) into the dilated-conv weights (exact algebra) --
    Wf_top = wf[:, :, :Fm]                          # (L, F, F)
    Wf_bot = wf[:, :, Fm:]                          # (L, F, F)
    Wc = (jnp.einsum('lom,lmc->loc', Wf_top, wd1[:, 1])
          + jnp.einsum('lom,lmc->loc', Wf_bot, wd2[:, 1]))
    Wp1 = jnp.einsum('lom,lmc->loc', Wf_top, wd1[:, 0])
    Wn1 = jnp.einsum('lom,lmc->loc', Wf_top, wd1[:, 2])
    Wp2 = jnp.einsum('lom,lmc->loc', Wf_bot, wd2[:, 0])
    Wn2 = jnp.einsum('lom,lmc->loc', Wf_bot, wd2[:, 2])
    b_l = (jnp.einsum('lom,lm->lo', Wf_top, bd1)
           + jnp.einsum('lom,lm->lo', Wf_bot, bd2) + bf_)[:, :, None]   # (L, F, 1)

    bf16 = jnp.bfloat16
    # Stack the 5 tap weights along K -> one (Fm, 5*Fm) matmul per layer.
    # Band order must match the kernel's tap staging: [center, -d1, +d1, -d2, +d2].
    W_stack = jnp.concatenate([Wc, Wp1, Wn1, Wp2, Wn2], axis=2).astype(bf16)
    w_in_b = w_in.astype(bf16)

    # Sublane-pad the output projection so the final (C, T) store is dense.
    C_pad = _round_up(C, 8)
    w_out_p = jnp.zeros((C_pad, Fm), jnp.float32).at[:C].set(w_out).astype(bf16)
    b_out_p = jnp.zeros((C_pad, 1), jnp.float32).at[:C, 0].set(b_out)
    b_in_c = b_in[:, None]                          # (F, 1)

    budget = _vmem_budget_bytes()

    # ------------------ stage 1: conv_1x1_in, streamed over time ------------------
    est1 = (2 * (D * tT * 4) + 2 * (Fm * tT * 4)
            + 2 * (Fm * D * 2 + Fm * 4) + (2 << 20))
    f_feat = pl.pallas_call(
        _conv_in_kernel,
        out_shape=jax.ShapeDtypeStruct((N, Fm, T_pad), jnp.float32),
        grid=(N, nT),
        in_specs=[
            pl.BlockSpec((1, D, tT), lambda n, t: (n, 0, t)),
            pl.BlockSpec((Fm, D), lambda n, t: (0, 0)),
            pl.BlockSpec((Fm, 1), lambda n, t: (0, 0)),
        ],
        out_specs=pl.BlockSpec((1, Fm, tT), lambda n, t: (n, 0, t)),
        compiler_params=pltpu.CompilerParams(
            dimension_semantics=("parallel", "parallel"),
            vmem_limit_bytes=int(min(budget, max(est1, 16 << 20)))),
    )(x, w_in_b, b_in_c)

    # ------------- stage 2: dilated residual layers + conv_out (per sample) -------
    d_max = 2 ** (L - 1)
    off = _round_up(d_max, 128)                     # lane-aligned live-band offset
    w_scr = off + T_pad + off                       # zero halo on both sides

    est2 = (2 * (Fm * T_pad * 4) + 2 * (C_pad * T_pad * 4)
            + Fm * w_scr * 2 + 5 * Fm * T_pad * 2
            + 3 * (Fm * T_pad * 4)
            + 2 * (L * Fm * 5 * Fm * 2 + L * Fm * 4 + C_pad * Fm * 2 + C_pad * 4)
            + (2 << 20))

    kernel = functools.partial(_pg_layers_kernel, num_layers=L, off=off, t_real=T)
    full = lambda a: pl.BlockSpec(a.shape, lambda n: (0,) * a.ndim)

    out_p = pl.pallas_call(
        kernel,
        out_shape=jax.ShapeDtypeStruct((N, C_pad, T_pad), jnp.float32),
        grid=(N,),
        in_specs=[
            pl.BlockSpec((1, Fm, T_pad), lambda n: (n, 0, 0)),
            full(W_stack), full(b_l), full(w_out_p), full(b_out_p),
        ],
        out_specs=pl.BlockSpec((1, C_pad, T_pad), lambda n: (n, 0, 0)),
        scratch_shapes=[pltpu.VMEM((Fm, w_scr), bf16),
                        pltpu.VMEM((5 * Fm, T_pad), bf16)],
        compiler_params=pltpu.CompilerParams(
            dimension_semantics=("parallel",),
            vmem_limit_bytes=int(min(budget, max(est2, 16 << 20)))),
    )(f_feat, W_stack, b_l, w_out_p, b_out_p)

    return out_p[:, :C, :T]                         # (N, num_classes, T), NCW


# ------------------------- plain-JAX f32 reference ----------------------------
def _reference(x, params, *, num_layers):
    (w_in, b_in, wd1, bd1, wd2, bd2, wf, bf_, w_out, b_out) = params
    N, D, T = x.shape
    Fm = w_in.shape[0]
    f = jnp.einsum('od,ndt->not', w_in, x) + b_in[None, :, None]

    def dconv(feat, w3, b, d):
        fp = jnp.pad(feat, ((0, 0), (0, 0), (d, d)))
        return (jnp.einsum('oc,nct->not', w3[0], fp[:, :, 0:T])
                + jnp.einsum('oc,nct->not', w3[1], fp[:, :, d:d + T])
                + jnp.einsum('oc,nct->not', w3[2], fp[:, :, 2 * d:2 * d + T])
                + b[None, :, None])

    for i in range(num_layers):
        d1 = 2 ** (num_layers - 1 - i)
        d2 = 2 ** i
        f_in = f
        y1 = dconv(f, wd1[i], bd1[i], d1)
        y2 = dconv(f, wd2[i], bd2[i], d2)
        fused = (jnp.einsum('om,nmt->not', wf[i, :, :Fm], y1)
                 + jnp.einsum('om,nmt->not', wf[i, :, Fm:], y2)
                 + bf_[i][None, :, None])
        f = jnp.maximum(fused, 0.0) + f_in

    return jnp.einsum('of,nft->not', w_out, f) + b_out[None, :, None]


# ------------------------- parameter construction -----------------------------
def make_params(key, *, num_layers, num_f_maps, dim, num_classes):
    ks = jax.random.split(key, 10)
    s = 0.1
    Fm = num_f_maps
    w_in = s * jax.random.normal(ks[0], (Fm, dim), jnp.float32)
    b_in = s * jax.random.normal(ks[1], (Fm,), jnp.float32)
    wd1 = s * jax.random.normal(ks[2], (num_layers, 3, Fm, Fm), jnp.float32)
    bd1 = s * jax.random.normal(ks[3], (num_layers, Fm), jnp.float32)
    wd2 = s * jax.random.normal(ks[4], (num_layers, 3, Fm, Fm), jnp.float32)
    bd2 = s * jax.random.normal(ks[5], (num_layers, Fm), jnp.float32)
    wf = s * jax.random.normal(ks[6], (num_layers, Fm, 2 * Fm), jnp.float32)
    bf_ = s * jax.random.normal(ks[7], (num_layers, Fm), jnp.float32)
    w_out = s * jax.random.normal(ks[8], (num_classes, Fm), jnp.float32)
    b_out = s * jax.random.normal(ks[9], (num_classes,), jnp.float32)
    return (w_in, b_in, wd1, bd1, wd2, bd2, wf, bf_, w_out, b_out)


if __name__ == "__main__":
    num_layers = 3
    num_f_maps = 16
    dim = 8
    num_classes = 6
    N, T = 2, 20          # T deliberately NOT a multiple of 128: exercises padding

    key = jax.random.PRNGKey(0)
    kx, kp = jax.random.split(key)
    x = jax.random.normal(kx, (N, dim, T), jnp.float32)     # NCW like PyTorch
    params = make_params(kp, num_layers=num_layers, num_f_maps=num_f_maps,
                         dim=dim, num_classes=num_classes)

    fn = jax.jit(functools.partial(prediction_generation, num_layers=num_layers))
    out = jax.block_until_ready(fn(x, params))

    ref = _reference(x, params, num_layers=num_layers)
    assert out.shape == (N, num_classes, T)
    # bf16 MXU operands -> slightly looser tolerance than the pure-f32 reference.
    assert jnp.allclose(out, ref, atol=2e-2, rtol=2e-2), "mismatch vs JAX reference"

    print("KERNEL_OK")
</pallas_src>

<mosaic_0001>
module attributes {stable_mosaic.version = 11 : i64} {
  func.func @_conv_in_kernel(%arg0: i32, %arg1: i32, %arg2: memref<1x8x128xf32, #tpu.memory_space<vmem>>, %arg3: memref<16x8xbf16, #tpu.memory_space<vmem>>, %arg4: memref<16x1xf32, #tpu.memory_space<vmem>>, %arg5: memref<1x16x128xf32, #tpu.memory_space<vmem>>) attributes {dimension_semantics = [#tpu.dimension_semantics<parallel>, #tpu.dimension_semantics<parallel>], iteration_bounds = array<i64: 2, 1>, scalar_prefetch = 0 : i64, scratch_operands = 0 : i64, tpu.core_type = #tpu.core_type<tc>, window_params = [{transform_indices = @transform_0, window_bounds = array<i64: 1, 8, 128>}, {pipeline_mode = #tpu.pipeline_mode<synchronous>, transform_indices = @transform_1, window_bounds = array<i64: 16, 8>}, {pipeline_mode = #tpu.pipeline_mode<synchronous>, transform_indices = @transform_2, window_bounds = array<i64: 16, 1>}, {transform_indices = @transform_3, window_bounds = array<i64: 1, 16, 128>}]} {
    %c0 = arith.constant 0 : index
    %c0_0 = arith.constant 0 : index
    %c0_1 = arith.constant 0 : index
    %0 = vector.load %arg2[%c0, %c0_0, %c0_1] : memref<1x8x128xf32, #tpu.memory_space<vmem>>, vector<1x8x128xf32>
    %1 = vector.shape_cast %0 : vector<1x8x128xf32> to vector<8x128xf32>
    %2 = arith.truncf %1 : vector<8x128xf32> to vector<8x128xbf16>
    %c0_2 = arith.constant 0 : index
    %c0_3 = arith.constant 0 : index
    %3 = vector.load %arg3[%c0_2, %c0_3] : memref<16x8xbf16, #tpu.memory_space<vmem>>, vector<16x8xbf16>
    %cst = arith.constant dense<0.000000e+00> : vector<16x128xf32>
    %4 = tpu.matmul %3, %2, %cst {dimension_numbers = #tpu.dot_dimension_numbers<[1], [0], [0], [1], [0, 0, 1, 1], [], []>} : vector<16x8xbf16>, vector<8x128xbf16>, vector<16x128xf32> -> vector<16x128xf32>
    %c0_4 = arith.constant 0 : index
    %c0_5 = arith.constant 0 : index
    %5 = vector.load %arg4[%c0_4, %c0_5] : memref<16x1xf32, #tpu.memory_space<vmem>>, vector<16x1xf32>
    %6 = vector.broadcast %5 : vector<16x1xf32> to vector<16x128xf32>
    %7 = arith.addf %4, %6 : vector<16x128xf32>
    %c0_6 = arith.constant 0 : index
    %c0_7 = arith.constant 0 : index
    %c0_8 = arith.constant 0 : index
    %8 = vector.load %arg5[%c0_6, %c0_7, %c0_8] : memref<1x16x128xf32, #tpu.memory_space<vmem>>, vector<1x16x128xf32>
    %9 = vector.shape_cast %8 : vector<1x16x128xf32> to vector<16x128xf32>
    %10 = vector.shape_cast %7 : vector<16x128xf32> to vector<1x16x128xf32>
    tpu.vector_store %arg5[%c0_6, %c0_7, %c0_8], %10 {strides = array<i32>} : memref<1x16x128xf32, #tpu.memory_space<vmem>>, vector<1x16x128xf32>,
    return
  }
  func.func @transform_0(%arg0: i32, %arg1: i32) -> (i32, i32, i32) {
    %c0_i32 = arith.constant 0 : i32
    %c0_i32_0 = arith.constant 0 : i32
    return %arg0, %c0_i32, %arg1 : i32, i32, i32
  }
  func.func @transform_1(%arg0: i32, %arg1: i32) -> (i32, i32) {
    %c0_i32 = arith.constant 0 : i32
    %c0_i32_0 = arith.constant 0 : i32
    %c0_i32_1 = arith.constant 0 : i32
    return %c0_i32, %c0_i32_0 : i32, i32
  }
  func.func @transform_2(%arg0: i32, %arg1: i32) -> (i32, i32) {
    %c0_i32 = arith.constant 0 : i32
    %c0_i32_0 = arith.constant 0 : i32
    %c0_i32_1 = arith.constant 0 : i32
    return %c0_i32, %c0_i32_0 : i32, i32
  }
  func.func @transform_3(%arg0: i32, %arg1: i32) -> (i32, i32, i32) {
    %c0_i32 = arith.constant 0 : i32
    %c0_i32_0 = arith.constant 0 : i32
    return %arg0, %c0_i32, %arg1 : i32, i32, i32
  }
}

module attributes {stable_mosaic.version = 11 : i64} {
  func.func @_pg_layers_kernel(%arg0: i32, %arg1: memref<1x16x128xf32, #tpu.memory_space<vmem>>, %arg2: memref<3x16x80xbf16, #tpu.memory_space<vmem>>, %arg3: memref<3x16x1xf32, #tpu.memory_space<vmem>>, %arg4: memref<8x16xbf16, #tpu.memory_space<vmem>>, %arg5: memref<8x1xf32, #tpu.memory_space<vmem>>, %arg6: memref<1x8x128xf32, #tpu.memory_space<vmem>>, %arg7: memref<16x384xbf16, #tpu.memory_space<vmem>>, %arg8: memref<80x128xbf16, #tpu.memory_space<vmem>>) attributes {dimension_semantics = [#tpu.dimension_semantics<parallel>], iteration_bounds = array<i64: 2>, scalar_prefetch = 0 : i64, scratch_operands = 2 : i64, tpu.core_type = #tpu.core_type<tc>, window_params = [{transform_indices = @transform_0, window_bounds = array<i64: 1, 16, 128>}, {pipeline_mode = #tpu.pipeline_mode<synchronous>, transform_indices = @transform_1, window_bounds = array<i64: 3, 16, 80>}, {pipeline_mode = #tpu.pipeline_mode<synchronous>, transform_indices = @transform_2, window_bounds = array<i64: 3, 16, 1>}, {pipeline_mode = #tpu.pipeline_mode<synchronous>, transform_indices = @transform_3, window_bounds = array<i64: 8, 16>}, {pipeline_mode = #tpu.pipeline_mode<synchronous>, transform_indices = @transform_4, window_bounds = array<i64: 8, 1>}, {transform_indices = @transform_5, window_bounds = array<i64: 1, 8, 128>}]} {
    %cst = arith.constant 0.000000e+00 : bf16
    %0 = vector.broadcast %cst : bf16 to vector<16x128xbf16>
    %c0 = arith.constant 0 : index
    %c0_0 = arith.constant 0 : index
    %1 = vector.load %arg7[%c0, %c0_0] : memref<16x384xbf16, #tpu.memory_space<vmem>>, vector<16x128xbf16>
    tpu.vector_store %arg7[%c0, %c0_0], %0 {strides = array<i32>} : memref<16x384xbf16, #tpu.memory_space<vmem>>, vector<16x128xbf16>,
    %cst_1 = arith.constant 0.000000e+00 : bf16
    %2 = vector.broadcast %cst_1 : bf16 to vector<16x128xbf16>
    %c0_2 = arith.constant 0 : index
    %c256 = arith.constant 256 : index
    %3 = vector.load %arg7[%c0_2, %c256] : memref<16x384xbf16, #tpu.memory_space<vmem>>, vector<16x128xbf16>
    tpu.vector_store %arg7[%c0_2, %c256], %2 {strides = array<i32>} : memref<16x384xbf16, #tpu.memory_space<vmem>>, vector<16x128xbf16>,
    %cst_3 = arith.constant 0.000000e+00 : bf16
    %4 = vector.broadcast %cst_3 : bf16 to vector<16x108xbf16>
    %c0_4 = arith.constant 0 : index
    %c148 = arith.constant 148 : index
    %5 = vector.load %arg7[%c0_4, %c148] : memref<16x384xbf16, #tpu.memory_space<vmem>>, vector<16x108xbf16>
    tpu.vector_store %arg7[%c0_4, %c148], %4 {strides = array<i32>} : memref<16x384xbf16, #tpu.memory_space<vmem>>, vector<16x108xbf16>,
    %c0_5 = arith.constant 0 : index
    %c0_6 = arith.constant 0 : index
    %c0_7 = arith.constant 0 : index
    %6 = vector.load %arg1[%c0_5, %c0_6, %c0_7] : memref<1x16x128xf32, #tpu.memory_space<vmem>>, vector<1x16x128xf32>
    %7 = vector.shape_cast %6 : vector<1x16x128xf32> to vector<16x128xf32>
    %8 = arith.truncf %7 : vector<16x128xf32> to vector<16x128xbf16>
    %9 = vector.extract_strided_slice %8 {offsets = [0, 0], sizes = [16, 20], strides = [1, 1]} : vector<16x128xbf16> to vector<16x20xbf16>
    %c0_8 = arith.constant 0 : index
    %c128 = arith.constant 128 : index
    %10 = vector.load %arg7[%c0_8, %c128] : memref<16x384xbf16, #tpu.memory_space<vmem>>, vector<16x20xbf16>
    tpu.vector_store %arg7[%c0_8, %c128], %9 {strides = array<i32>} : memref<16x384xbf16, #tpu.memory_space<vmem>>, vector<16x20xbf16>,
    %c0_9 = arith.constant 0 : index
    %c0_10 = arith.constant 0 : index
    %11 = vector.load %arg8[%c0_9, %c0_10] : memref<80x128xbf16, #tpu.memory_space<vmem>>, vector<16x128xbf16>
    tpu.vector_store %arg8[%c0_9, %c0_10], %8 {strides = array<i32>} : memref<80x128xbf16, #tpu.memory_space<vmem>>, vector<16x128xbf16>,
    %c0_11 = arith.constant 0 : index
    %c124 = arith.constant 124 : index
    %12 = vector.load %arg7[%c0_11, %c124] : memref<16x384xbf16, #tpu.memory_space<vmem>>, vector<16x128xbf16>
    %c16 = arith.constant 16 : index
    %c0_12 = arith.constant 0 : index
    %13 = vector.load %arg8[%c16, %c0_12] : memref<80x128xbf16, #tpu.memory_space<vmem>>, vector<16x128xbf16>
    tpu.vector_store %arg8[%c16, %c0_12], %12 {strides = array<i32>} : memref<80x128xbf16, #tpu.memory_space<vmem>>, vector<16x128xbf16>,
    %c0_13 = arith.constant 0 : index
    %c132 = arith.constant 132 : index
    %14 = vector.load %arg7[%c0_13, %c132] : memref<16x384xbf16, #tpu.memory_space<vmem>>, vector<16x128xbf16>
    %c32 = arith.constant 32 : index
    %c0_14 = arith.constant 0 : index
    %15 = vector.load %arg8[%c32, %c0_14] : memref<80x128xbf16, #tpu.memory_space<vmem>>, vector<16x128xbf16>
    tpu.vector_store %arg8[%c32, %c0_14], %14 {strides = array<i32>} : memref<80x128xbf16, #tpu.memory_space<vmem>>, vector<16x128xbf16>,
    %c0_15 = arith.constant 0 : index
    %c127 = arith.constant 127 : index
    %16 = vector.load %arg7[%c0_15, %c127] : memref<16x384xbf16, #tpu.memory_space<vmem>>, vector<16x128xbf16>
    %c48 = arith.constant 48 : index
    %c0_16 = arith.constant 0 : index
    %17 = vector.load %arg8[%c48, %c0_16] : memref<80x128xbf16, #tpu.memory_space<vmem>>, vector<16x128xbf16>
    tpu.vector_store %arg8[%c48, %c0_16], %16 {strides = array<i32>} : memref<80x128xbf16, #tpu.memory_space<vmem>>, vector<16x128xbf16>,
    %c0_17 = arith.constant 0 : index
    %c129 = arith.constant 129 : index
    %18 = vector.load %arg7[%c0_17, %c129] : memref<16x384xbf16, #tpu.memory_space<vmem>>, vector<16x128xbf16>
    %c64 = arith.constant 64 : index
    %c0_18 = arith.constant 0 : index
    %19 = vector.load %arg8[%c64, %c0_18] : memref<80x128xbf16, #tpu.memory_space<vmem>>, vector<16x128xbf16>
    tpu.vector_store %arg8[%c64, %c0_18], %18 {strides = array<i32>} : memref<80x128xbf16, #tpu.memory_space<vmem>>, vector<16x128xbf16>,
    %c0_19 = arith.constant 0 : index
    %c0_20 = arith.constant 0 : index
    %c0_21 = arith.constant 0 : index
    %20 = vector.load %arg2[%c0_19, %c0_20, %c0_21] : memref<3x16x80xbf16, #tpu.memory_space<vmem>>, vector<1x16x80xbf16>
    %21 = vector.shape_cast %20 : vector<1x16x80xbf16> to vector<16x80xbf16>
    %c0_22 = arith.constant 0 : index
    %c0_23 = arith.constant 0 : index
    %22 = vector.load %arg8[%c0_22, %c0_23] : memref<80x128xbf16, #tpu.memory_space<vmem>>, vector<80x128xbf16>
    %cst_24 = arith.constant dense<0.000000e+00> : vector<16x128xf32>
    %23 = tpu.matmul %21, %22, %cst_24 {dimension_numbers = #tpu.dot_dimension_numbers<[1], [0], [0], [1], [0, 0, 1, 1], [], []>} : vector<16x80xbf16>, vector<80x128xbf16>, vector<16x128xf32> -> vector<16x128xf32>
    %c0_25 = arith.constant 0 : index
    %c0_26 = arith.constant 0 : index
    %c0_27 = arith.constant 0 : index
    %24 = vector.load %arg3[%c0_25, %c0_26, %c0_27] : memref<3x16x1xf32, #tpu.memory_space<vmem>>, vector<1x16x1xf32>
    %25 = vector.shape_cast %24 : vector<1x16x1xf32> to vector<16x1xf32>
    %26 = vector.broadcast %25 : vector<16x1xf32> to vector<16x128xf32>
    %27 = arith.addf %23, %26 : vector<16x128xf32>
    %cst_28 = arith.constant 0.000000e+00 : f32
    %28 = vector.broadcast %cst_28 : f32 to vector<16x128xf32>
    %29 = arith.maximumf %27, %28 : vector<16x128xf32>
    %30 = arith.addf %29, %7 : vector<16x128xf32>
    %31 = arith.truncf %30 : vector<16x128xf32> to vector<16x128xbf16>
    %32 = vector.extract_strided_slice %31 {offsets = [0, 0], sizes = [16, 20], strides = [1, 1]} : vector<16x128xbf16> to vector<16x20xbf16>
    %c0_29 = arith.constant 0 : index
    %c128_30 = arith.constant 128 : index
    %33 = vector.load %arg7[%c0_29, %c128_30] : memref<16x384xbf16, #tpu.memory_space<vmem>>, vector<16x20xbf16>
    tpu.vector_store %arg7[%c0_29, %c128_30], %32 {strides = array<i32>} : memref<16x384xbf16, #tpu.memory_space<vmem>>, vector<16x20xbf16>,
    %c0_31 = arith.constant 0 : index
    %c0_32 = arith.constant 0 : index
    %34 = vector.load %arg8[%c0_31, %c0_32] : memref<80x128xbf16, #tpu.memory_space<vmem>>, vector<16x128xbf16>
    tpu.vector_store %arg8[%c0_31, %c0_32], %31 {strides = array<i32>} : memref<80x128xbf16, #tpu.memory_space<vmem>>, vector<16x128xbf16>,
    %c0_33 = arith.constant 0 : index
    %c126 = arith.constant 126 : index
    %35 = vector.load %arg7[%c0_33, %c126] : memref<16x384xbf16, #tpu.memory_space<vmem>>, vector<16x128xbf16>
    %c16_34 = arith.constant 16 : index
    %c0_35 = arith.constant 0 : index
    %36 = vector.load %arg8[%c16_34, %c0_35] : memref<80x128xbf16, #tpu.memory_space<vmem>>, vector<16x128xbf16>
    tpu.vector_store %arg8[%c16_34, %c0_35], %35 {strides = array<i32>} : memref<80x128xbf16, #tpu.memory_space<vmem>>, vector<16x128xbf16>,
    %c0_36 = arith.constant 0 : index
    %c130 = arith.constant 130 : index
    %37 = vector.load %arg7[%c0_36, %c130] : memref<16x384xbf16, #tpu.memory_space<vmem>>, vector<16x128xbf16>
    %c32_37 = arith.constant 32 : index
    %c0_38 = arith.constant 0 : index
    %38 = vector.load %arg8[%c32_37, %c0_38] : memref<80x128xbf16, #tpu.memory_space<vmem>>, vector<16x128xbf16>
    tpu.vector_store %arg8[%c32_37, %c0_38], %37 {strides = array<i32>} : memref<80x128xbf16, #tpu.memory_space<vmem>>, vector<16x128xbf16>,
    %c0_39 = arith.constant 0 : index
    %c126_40 = arith.constant 126 : index
    %39 = vector.load %arg7[%c0_39, %c126_40] : memref<16x384xbf16, #tpu.memory_space<vmem>>, vector<16x128xbf16>
    %c48_41 = arith.constant 48 : index
    %c0_42 = arith.constant 0 : index
    %40 = vector.load %arg8[%c48_41, %c0_42] : memref<80x128xbf16, #tpu.memory_space<vmem>>, vector<16x128xbf16>
    tpu.vector_store %arg8[%c48_41, %c0_42], %39 {strides = array<i32>} : memref<80x128xbf16, #tpu.memory_space<vmem>>, vector<16x128xbf16>,
    %c0_43 = arith.constant 0 : index
    %c130_44 = arith.constant 130 : index
    %41 = vector.load %arg7[%c0_43, %c130_44] : memref<16x384xbf16, #tpu.memory_space<vmem>>, vector<16x128xbf16>
    %c64_45 = arith.constant 64 : index
    %c0_46 = arith.constant 0 : index
    %42 = vector.load %arg8[%c64_45, %c0_46] : memref<80x128xbf16, #tpu.memory_space<vmem>>, vector<16x128xbf16>
    tpu.vector_store %arg8[%c64_45, %c0_46], %41 {strides = array<i32>} : memref<80x128xbf16, #tpu.memory_space<vmem>>, vector<16x128xbf16>,
    %c1 = arith.constant 1 : index
    %c0_47 = arith.constant 0 : index
    %c0_48 = arith.constant 0 : index
    %43 = vector.load %arg2[%c1, %c0_47, %c0_48] : memref<3x16x80xbf16, #tpu.memory_space<vmem>>, vector<1x16x80xbf16>
    %44 = vector.shape_cast %43 : vector<1x16x80xbf16> to vector<16x80xbf16>
    %c0_49 = arith.constant 0 : index
    %c0_50 = arith.constant 0 : index
    %45 = vector.load %arg8[%c0_49, %c0_50] : memref<80x128xbf16, #tpu.memory_space<vmem>>, vector<80x128xbf16>
    %cst_51 = arith.constant dense<0.000000e+00> : vector<16x128xf32>
    %46 = tpu.matmul %44, %45, %cst_51 {dimension_numbers = #tpu.dot_dimension_numbers<[1], [0], [0], [1], [0, 0, 1, 1], [], []>} : vector<16x80xbf16>, vector<80x128xbf16>, vector<16x128xf32> -> vector<16x128xf32>
    %c1_52 = arith.constant 1 : index
    %c0_53 = arith.constant 0 : index
    %c0_54 = arith.constant 0 : index
    %47 = vector.load %arg3[%c1_52, %c0_53, %c0_54] : memref<3x16x1xf32, #tpu.memory_space<vmem>>, vector<1x16x1xf32>
    %48 = vector.shape_cast %47 : vector<1x16x1xf32> to vector<16x1xf32>
    %49 = vector.broadcast %48 : vector<16x1xf32> to vector<16x128xf32>
    %50 = arith.addf %46, %49 : vector<16x128xf32>
    %cst_55 = arith.constant 0.000000e+00 : f32
    %51 = vector.broadcast %cst_55 : f32 to vector<16x128xf32>
    %52 = arith.maximumf %50, %51 : vector<16x128xf32>
    %53 = arith.addf %52, %30 : vector<16x128xf32>
    %54 = arith.truncf %53 : vector<16x128xf32> to vector<16x128xbf16>
    %55 = vector.extract_strided_slice %54 {offsets = [0, 0], sizes = [16, 20], strides = [1, 1]} : vector<16x128xbf16> to vector<16x20xbf16>
    %c0_56 = arith.constant 0 : index
    %c128_57 = arith.constant 128 : index
    %56 = vector.load %arg7[%c0_56, %c128_57] : memref<16x384xbf16, #tpu.memory_space<vmem>>, vector<16x20xbf16>
    tpu.vector_store %arg7[%c0_56, %c128_57], %55 {strides = array<i32>} : memref<16x384xbf16, #tpu.memory_space<vmem>>, vector<16x20xbf16>,
    %c0_58 = arith.constant 0 : index
    %c0_59 = arith.constant 0 : index
    %57 = vector.load %arg8[%c0_58, %c0_59] : memref<80x128xbf16, #tpu.memory_space<vmem>>, vector<16x128xbf16>
    tpu.vector_store %arg8[%c0_58, %c0_59], %54 {strides = array<i32>} : memref<80x128xbf16, #tpu.memory_space<vmem>>, vector<16x128xbf16>,
    %c0_60 = arith.constant 0 : index
    %c127_61 = arith.constant 127 : index
    %58 = vector.load %arg7[%c0_60, %c127_61] : memref<16x384xbf16, #tpu.memory_space<vmem>>, vector<16x128xbf16>
    %c16_62 = arith.constant 16 : index
    %c0_63 = arith.constant 0 : index
    %59 = vector.load %arg8[%c16_62, %c0_63] : memref<80x128xbf16, #tpu.memory_space<vmem>>, vector<16x128xbf16>
    tpu.vector_store %arg8[%c16_62, %c0_63], %58 {strides = array<i32>} : memref<80x128xbf16, #tpu.memory_space<vmem>>, vector<16x128xbf16>,
    %c0_64 = arith.constant 0 : index
    %c129_65 = arith.constant 129 : index
    %60 = vector.load %arg7[%c0_64, %c129_65] : memref<16x384xbf16, #tpu.memory_space<vmem>>, vector<16x128xbf16>
    %c32_66 = arith.constant 32 : index
    %c0_67 = arith.constant 0 : index
    %61 = vector.load %arg8[%c32_66, %c0_67] : memref<80x128xbf16, #tpu.memory_space<vmem>>, vector<16x128xbf16>
    tpu.vector_store %arg8[%c32_66, %c0_67], %60 {strides = array<i32>} : memref<80x128xbf16, #tpu.memory_space<vmem>>, vector<16x128xbf16>,
    %c0_68 = arith.constant 0 : index
    %c124_69 = arith.constant 124 : index
    %62 = vector.load %arg7[%c0_68, %c124_69] : memref<16x384xbf16, #tpu.memory_space<vmem>>, vector<16x128xbf16>
    %c48_70 = arith.constant 48 : index
    %c0_71 = arith.constant 0 : index
    %63 = vector.load %arg8[%c48_70, %c0_71] : memref<80x128xbf16, #tpu.memory_space<vmem>>, vector<16x128xbf16>
    tpu.vector_store %arg8[%c48_70, %c0_71], %62 {strides = array<i32>} : memref<80x128xbf16, #tpu.memory_space<vmem>>, vector<16x128xbf16>,
    %c0_72 = arith.constant 0 : index
    %c132_73 = arith.constant 132 : index
    %64 = vector.load %arg7[%c0_72, %c132_73] : memref<16x384xbf16, #tpu.memory_space<vmem>>, vector<16x128xbf16>
    %c64_74 = arith.constant 64 : index
    %c0_75 = arith.constant 0 : index
    %65 = vector.load %arg8[%c64_74, %c0_75] : memref<80x128xbf16, #tpu.memory_space<vmem>>, vector<16x128xbf16>
    tpu.vector_store %arg8[%c64_74, %c0_75], %64 {strides = array<i32>} : memref<80x128xbf16, #tpu.memory_space<vmem>>, vector<16x128xbf16>,
    %c2 = arith.constant 2 : index
    %c0_76 = arith.constant 0 : index
    %c0_77 = arith.constant 0 : index
    %66 = vector.load %arg2[%c2, %c0_76, %c0_77] : memref<3x16x80xbf16, #tpu.memory_space<vmem>>, vector<1x16x80xbf16>
    %67 = vector.shape_cast %66 : vector<1x16x80xbf16> to vector<16x80xbf16>
    %c0_78 = arith.constant 0 : index
    %c0_79 = arith.constant 0 : index
    %68 = vector.load %arg8[%c0_78, %c0_79] : memref<80x128xbf16, #tpu.memory_space<vmem>>, vector<80x128xbf16>
    %cst_80 = arith.constant dense<0.000000e+00> : vector<16x128xf32>
    %69 = tpu.matmul %67, %68, %cst_80 {dimension_numbers = #tpu.dot_dimension_numbers<[1], [0], [0], [1], [0, 0, 1, 1], [], []>} : vector<16x80xbf16>, vector<80x128xbf16>, vector<16x128xf32> -> vector<16x128xf32>
    %c2_81 = arith.constant 2 : index
    %c0_82 = arith.constant 0 : index
    %c0_83 = arith.constant 0 : index
    %70 = vector.load %arg3[%c2_81, %c0_82, %c0_83] : memref<3x16x1xf32, #tpu.memory_space<vmem>>, vector<1x16x1xf32>
    %71 = vector.shape_cast %70 : vector<1x16x1xf32> to vector<16x1xf32>
    %72 = vector.broadcast %71 : vector<16x1xf32> to vector<16x128xf32>
    %73 = arith.addf %69, %72 : vector<16x128xf32>
    %cst_84 = arith.constant 0.000000e+00 : f32
    %74 = vector.broadcast %cst_84 : f32 to vector<16x128xf32>
    %75 = arith.maximumf %73, %74 : vector<16x128xf32>
    %76 = arith.addf %75, %53 : vector<16x128xf32>
    %c0_85 = arith.constant 0 : index
    %c0_86 = arith.constant 0 : index
    %77 = vector.load %arg4[%c0_85, %c0_86] : memref<8x16xbf16, #tpu.memory_space<vmem>>, vector<8x16xbf16>
    %78 = arith.truncf %76 : vector<16x128xf32> to vector<16x128xbf16>
    %cst_87 = arith.constant dense<0.000000e+00> : vector<8x128xf32>
    %79 = tpu.matmul %77, %78, %cst_87 {dimension_numbers = #tpu.dot_dimension_numbers<[1], [0], [0], [1], [0, 0, 1, 1], [], []>} : vector<8x16xbf16>, vector<16x128xbf16>, vector<8x128xf32> -> vector<8x128xf32>
    %c0_88 = arith.constant 0 : index
    %c0_89 = arith.constant 0 : index
    %80 = vector.load %arg5[%c0_88, %c0_89] : memref<8x1xf32, #tpu.memory_space<vmem>>, vector<8x1xf32>
    %81 = vector.broadcast %80 : vector<8x1xf32> to vector<8x128xf32>
    %82 = arith.addf %79, %81 : vector<8x128xf32>
    %c0_90 = arith.constant 0 : index
    %c0_91 = arith.constant 0 : index
    %c0_92 = arith.constant 0 : index
    %83 = vector.load %arg6[%c0_90, %c0_91, %c0_92] : memref<1x8x128xf32, #tpu.memory_space<vmem>>, vector<1x8x128xf32>
    %84 = vector.shape_cast %83 : vector<1x8x128xf32> to vector<8x128xf32>
    %85 = vector.shape_cast %82 : vector<8x128xf32> to vector<1x8x128xf32>
    tpu.vector_store %arg6[%c0_90, %c0_91, %c0_92], %85 {strides = array<i32>} : memref<1x8x128xf32, #tpu.memory_space<vmem>>, vector<1x8x128xf32>,
    return
  }
  func.func @transform_0(%arg0: i32) -> (i32, i32, i32) {
    %c0_i32 = arith.constant 0 : i32
    %c0_i32_0 = arith.constant 0 : i32
    %c0_i32_1 = arith.constant 0 : i32
    return %arg0, %c0_i32, %c0_i32_0 : i32, i32, i32
  }
  func.func @transform_1(%arg0: i32) -> (i32, i32, i32) {
    %c0_i32 = arith.constant 0 : i32
    %c0_i32_0 = arith.constant 0 : i32
    %c0_i32_1 = arith.constant 0 : i32
    %c0_i32_2 = arith.constant 0 : i32
    return %c0_i32, %c0_i32_0, %c0_i32_1 : i32, i32, i32
  }
  func.func @transform_2(%arg0: i32) -> (i32, i32, i32) {
    %c0_i32 = arith.constant 0 : i32
    %c0_i32_0 = arith.constant 0 : i32
    %c0_i32_1 = arith.constant 0 : i32
    %c0_i32_2 = arith.constant 0 : i32
    return %c0_i32, %c0_i32_0, %c0_i32_1 : i32, i32, i32
  }
  func.func @transform_3(%arg0: i32) -> (i32, i32) {
    %c0_i32 = arith.constant 0 : i32
    %c0_i32_0 = arith.constant 0 : i32
    %c0_i32_1 = arith.constant 0 : i32
    return %c0_i32, %c0_i32_0 : i32, i32
  }
  func.func @transform_4(%arg0: i32) -> (i32, i32) {
    %c0_i32 = arith.constant 0 : i32
    %c0_i32_0 = arith.constant 0 : i32
    %c0_i32_1 = arith.constant 0 : i32
    return %c0_i32, %c0_i32_0 : i32, i32
  }
  func.func @transform_5(%arg0: i32) -> (i32, i32, i32) {
    %c0_i32 = arith.constant 0 : i32
    %c0_i32_0 = arith.constant 0 : i32
    %c0_i32_1 = arith.constant 0 : i32
    return %arg0, %c0_i32, %c0_i32_0 : i32, i32, i32
  }
}

</mosaic_0001>

<bundles_post_ra>
// kernel: prediction_generation.2
= control target key start
LH: loop header
LB: loop body
LE: loop exit
PB: predicated region body
PF: predicated region fallthrough
CT: control target
= control target key end

     0   :  { %s413_s12 = smov 0   ;;  %s415_s13 = smov 0   ;;  %s455_s0 = inlined_call_operand.vmem [shape: f32[2,8,128], index: 0, kind: input, shape index: {}]   ;;  %s456_s1 = inlined_call_operand.vmem [shape: bf16[16,8], index: 1, kind: input, shape index: {}]   ;;  %s457_s2 = inlined_call_operand.vmem [shape: f32[16,1], index: 2, kind: input, shape index: {}]   ;;  %s458_s3 = inlined_call_operand.vmem [shape: f32[2,16,128], index: 3, kind: output, shape index: {}]  }
   0x1   :  { %s417_s14 = smov 0  }
   0x2 LB: > { %s25_s15 = sadd.s32 1, %s386_s13  ;;  %p329_p0 = scmp.ge.s32.totalorder %s390_s14, 1  ;;  %s390_s14 = sphi %s417_s14, %s13_s14   ;;  %s386_s13 = sphi %s415_s13, %s460_s13   ;;  %s382_s12 = sphi %s413_s12, %s459_s12  }
   0x3   : > { %p27_p1 = scmp.ge.s32.totalorder %s25_s15, 2  ;;  %p155_p2 = scmp.lt.s32.totalorder %s390_s14, 3 }
   0x5   : > { %s462_s15 = smov (%p27_p1, %s25_s15), 0  ;;  %p156_p3 = pnand %p329_p0, %p155_p2 }
   0x6   : > { %p184_p4 = scmp.lt.s32.totalorder (!%p156_p3), %s382_s12, 1 }
   0x7   : > { %159 = sbr.rel (%p156_p3) target bundleno = 159 (0x9f), region = 32 }
   0xc   : > { %v204_v0 = vld [vmem:[%s457_s2] sm:$0xff]  ;;  %v392_v1 = vmov 0   ;;  %s464_s12 = smov (!%p184_p4, %s382_s12), 1  ;;  %vm225_vm0 = vcmask 1043456   ;;  %v205_v4 = vld [vmem:[%s457_s2 + $0x8] sm:$0xff]  ;;  %vm221_vm1 = vcmask 64512  }
   0xd   : > { %367 = vset.pattern.permute.xlu0 %v392_v1  ;;  %s330_s18 = sshll.u32 %s464_s12, 3  ;;  %v341_v6 = vld [vmem:[%s456_s1] sm:$0xff]  ;;  %s340_s26 = sshll.u32 %s464_s12, 4 }
   0xe   : > { %208 = vperm.xlu0 %367, %v204_v0   ;;  %s190_s21 = scalar_lea.vmem %s455_s0, %s330_s18  ;;  %s198_s29 = scalar_lea.vmem %s458_s3, %s340_s26 }
   0xf   : > { %v200_v2 = vld [vmem:[%s190_s21] sm:$0xff] }
  0x10   : > { %v201_v3 = vpack.c.bf16 %v200_v2, %v200_v2 }
  0x12   : > { %v227_v5 = vsel %vm225_vm0, %v201_v3, 0 }
  0x13   : > { %236 = vmatpush.bf16.msra.mxu0 %v227_v5 }
  0x16   : > { %213 = vperm.xlu0 %367, %v205_v4   ;;  %337 = vmatmul.msk.bf16.vlgmr.msra.gmra.mxu0 %vm221_vm1, %v341_v6 }
  0x80   : > { %v209_v7 = vpop.permute.xlu0 %208 }
  0x88   : > { %v214_v10 = vpop.permute.xlu0 %213 }
  0x93   : > { %v238_v8 = vpop.f32.mrf.mxu0 }
  0x94   : > { %v239_v9 = vadd.f32 %v238_v8, %v209_v7 }
  0x96   : > { %243 = vst [vmem:[%s198_s29] sm:$0xff] %v239_v9 }
  0x9b   : > { %v240_v11 = vpop.f32.mrf.mxu0 }
  0x9c   : > { %v241_v12 = vadd.f32 %v240_v11, %v214_v10 }
  0x9e   : > { %244 = vst [vmem:[%s198_s29 + $0x8] sm:$0xff] %v241_v12 }
  0x9f PF: > { %s13_s14 = sadd.s32 1, %s390_s14   ;;  %s459_s12 = smov %s386_s13 }
  0xa0   : > { %p10_p5 = scmp.ge.s32.totalorder %s13_s14, 4   ;;  %s460_s13 = smov %s462_s15 }
  0xa2   :  { %12 = sbr.rel (!%p10_p5) target bundleno = 2 (0x2), region = 62 }

// kernel: prediction_generation.3
= control target key start
LH: loop header
LB: loop body
LE: loop exit
PB: predicated region body
PF: predicated region fallthrough
CT: control target
= control target key end

     0   :  { %s965_s18 = smov 0   ;;  %s1104_s0 = inlined_call_operand.vmem [shape: f32[2,16,128], index: 0, kind: input, shape index: {}]   ;;  %s1105_s1 = inlined_call_operand.vmem [shape: bf16[3,16,80], index: 1, kind: input, shape index: {}]   ;;  %s1106_s2 = inlined_call_operand.vmem [shape: f32[3,16,1], index: 2, kind: input, shape index: {}]   ;;  %s1107_s3 = inlined_call_operand.vmem [shape: bf16[8,16], index: 3, kind: input, shape index: {}]   ;;  %s1108_s4 = inlined_call_operand.vmem [shape: f32[8,1], index: 4, kind: input, shape index: {}]   ;;  %s1109_s5 = inlined_call_operand.vmem [shape: f32[2,8,128], index: 5, kind: output, shape index: {}]  }
   0x1 LB: > { %s774_s19 = sadd.s32 4294967295, %s926_s18   ;;  %p778_p0 = scmp.ge.s32.totalorder %s926_s18, 1  ;;  %s926_s18 = sphi %s965_s18, %s15_s18  }
   0x2   : > { %p187_p1 = scmp.lt.s32.totalorder %s926_s18, 3 }
   0x4   : > { %p188_p2 = pnand %p778_p0, %p187_p1 }
   0x5   : > { %p214_p3 = scmp.lt.s32.totalorder (!%p188_p2), %s774_s19, 1  ;;  %s929_s24 = smov (!%p188_p2), 127  }
   0x6   : > { %191 = sbr.rel (%p188_p2) target bundleno = 1065 (0x429), region = 40  ;;  %s930_s25 = smov (!%p188_p2), 1  }
   0x7   : > { %s931_s26 = smov (!%p188_p2), 124   ;;  %s932_s27 = smov (!%p188_p2), 4  }
   0x8   : > { %s933_s9 = smov (!%p188_p2), 126   ;;  %s934_s10 = smov (!%p188_p2), 2  }
   0xb   : > { %vm228_vm0 = vcmask 1043616   ;;  %v928_v0 = vmov 0   ;;  %s1111_s19 = smov (!%p214_p3, %s774_s19), 1  ;;  %vm235_vm1 = vcmask 158720   ;;  %vm267_vm2 = vcmask 1014784   ;;  %v321_v24 = vld [vmem:[%s1106_s2 + $0x8] sm:$0xff] }
   0xc   : > { %226 = vst [vmem:[#allocation2 + $0x8] sm:$0xf] %v928_v0  ;;  %918 = vset.pattern.permute.xlu0 %v928_v0  ;;  %917 = vset.pattern.permute.xlu2 %v928_v0  ;;  %s868_s20 = sshll.u32 %s1111_s19, 4  ;;  %vm301_vm3 = vcmask 1039360   ;;  %vm284_vm4 = vcmask 7168   ;;  %v320_v25 = vld [vmem:[%s1106_s2] sm:$0xff] }
   0xd   : > { %229 = vst.msk [vmem:[#allocation2 + $0x4] sm:$0xf] %vm228_vm0, %v928_v0  ;;  %919 = vset.pattern.permute.xlu1 %v928_v0  ;;  %s218_s23 = scalar_lea.vmem %s1104_s0, %s868_s20  ;;  %vm250_vm5 = vcmask 31744   ;;  %v869_v41 = vld [vmem:[%s1105_s1] sm:$0xff]  ;;  %vm367_vm6 = vcmask 654336   ;;  %v810_v59 = vld [vmem:[%s1106_s2 + $0x18] sm:$0xff] }
   0xe   : > { %224 = vst [vmem:[#allocation2] sm:$0xf] %v928_v0  ;;  %v979_v1 = vld [vmem:[%s218_s23] sm:$0xff]  ;;  %v981_v2 = vld [vmem:[%s218_s23 + $0x8] sm:$0xff]  ;;  %vm422_vm7 = vcmask 1031168   ;;  %vm405_vm8 = vcmask 15360  }
   0xf   : > { %225 = vst [vmem:[#allocation2 + $0xc] sm:$0xf] %v928_v0  ;;  %v233_v3 = vpack.c.bf16 %v979_v1, %v979_v1  ;;  %v234_v4 = vpack.c.bf16 %v981_v2, %v981_v2  ;;  %v890_v15 = vpack.c.bf16 %v981_v2, %v979_v1  ;;  %vm703_vm9 = vcmask 130048   ;;  %s781_s29 = sshll.u32 %s1111_s19, 3 }
  0x10   : > { %227 = vst [vmem:[#allocation2 + $0x14] sm:$0xf] %v928_v0  ;;  %s222_s7 = scalar_lea.vmem %s1109_s5, %s781_s29 }
  0x11   : > { %230 = vst.msk [vmem:[#allocation2 + $0x10] sm:$0xf] %vm228_vm0, %v928_v0 }
  0x12   : > { %236 = vst.msk [vmem:[#allocation2 + $0x4] sm:$0xf] %vm235_vm1, %v233_v3 }
  0x13   : > { %237 = vst.msk [vmem:[#allocation2 + $0x10] sm:$0xf] %vm235_vm1, %v234_v4 }
  0x14   : > { %891 = vst [vmem:[#allocation3] sm:$0xff] %v890_v15  }
  0x19   : > { %v291_v5 = vld [vmem:[#allocation2 + $0x4] sm:$0xff] }
  0x1a   : > { %v274_v6 = vld [vmem:[#allocation2] sm:$0xff]  ;;  %295 = vrot.lane.b32.xlu0 %v291_v5, %s929_s24  ;;  %261 = vrot.lane.b32.xlu2 %v291_v5, %s931_s26  ;;  %v292_v7 = vld [vmem:[#allocation2 + $0x10] sm:$0xff] }
  0x1b   : > { %278 = vrot.lane.b32.xlu1 %v274_v6, %s930_s25  ;;  %v275_v8 = vld [vmem:[#allocation2 + $0xc] sm:$0xff]  ;;  %v870_v40 = vld [vmem:[#allocation3] sm:$0xff] }
  0x22   : > { %297 = vrot.lane.b32.xlu0 %v292_v7, %s929_s24  ;;  %263 = vrot.lane.b32.xlu2 %v292_v7, %s931_s26 }
  0x23   : > { %280 = vrot.lane.b32.xlu1 %v275_v8, %s930_s25 }
  0x2a   : > { %244 = vrot.lane.b32.xlu0 %v274_v6, %s932_s27  ;;  %324 = vperm.xlu2 %917, %v320_v25  }
  0x2b   : > { %246 = vrot.lane.b32.xlu1 %v275_v8, %s932_s27 }
  0x32   : > { %329 = vperm.xlu0 %918, %v321_v24  }
  0x74   : > { %v262_v9 = vpop.permute.xlu2 %261 }
  0x75   : > { %v265_v10 = vrot.slane %v262_v9, 4 }
  0x77   : > { %v268_v11 = vsel %vm267_vm2, %v262_v9, %v265_v10 }
  0x78   : > { %272 = vst [vmem:[#allocation3 + $0x10] sm:$0xf] %v268_v11 }
  0x7c   : > { %v264_v12 = vpop.permute.xlu2 %263 }
  0x7d   : > { %v266_v13 = vrot.slane %v264_v12, 4 }
  0x7f   : > { %v269_v14 = vsel %vm267_vm2, %v264_v12, %v266_v13  ;;  %v809_v12 = vld [vmem:[%s1106_s2 + $0x10] sm:$0xff] }
  0x80   : > { %273 = vst [vmem:[#allocation3 + $0x14] sm:$0xf] %v269_v14 }
  0x84   : > { %v325_v42 = vpop.permute.xlu2 %324 }
  0x87   : > { %v872_v38 = vld [vmem:[#allocation3 + $0x10] sm:$0xff] }
  0x8c   : > { %v296_v16 = vpop.permute.xlu0 %295 }
  0x8d   : > { %v279_v17 = vpop.permute.xlu1 %278  ;;  %v299_v18 = vrot.slane %v296_v16, 4 }
  0x8e   : > { %v282_v19 = vrot.slane %v279_v17, 4 }
  0x8f   : > { %v302_v20 = vsel %vm301_vm3, %v296_v16, %v299_v18 }
  0x90   : > { %v285_v21 = vsel %vm284_vm4, %v279_v17, %v282_v19  ;;  %306 = vst [vmem:[#allocation3 + $0x20] sm:$0xf] %v302_v20 }
  0x91   : > { %289 = vst [vmem:[#allocation3 + $0x18] sm:$0xf] %v285_v21 }
  0x94   : > { %v298_v22 = vpop.permute.xlu0 %297 }
  0x95   : > { %v281_v23 = vpop.permute.xlu1 %280  ;;  %v300_v26 = vrot.slane %v298_v22, 4 }
  0x96   : > { %v283_v27 = vrot.slane %v281_v23, 4 }
  0x97   : > { %v303_v28 = vsel %vm301_vm3, %v298_v22, %v300_v26  ;;  %v875_v26 = vld [vmem:[%s1105_s1 + $0x8] sm:$0xff] }
  0x98   : > { %v286_v29 = vsel %vm284_vm4, %v281_v23, %v283_v27  ;;  %307 = vst [vmem:[#allocation3 + $0x24] sm:$0xf] %v303_v28 }
  0x99   : > { %290 = vst [vmem:[#allocation3 + $0x1c] sm:$0xf] %v286_v29 }
  0x9c   : > { %v245_v31 = vpop.permute.xlu0 %244 }
  0x9d   : > { %v247_v30 = vpop.permute.xlu1 %246  ;;  %v248_v33 = vrot.slane %v245_v31, 4 }
  0x9e   : > { %v249_v32 = vrot.slane %v247_v30, 4 }
  0x9f   : > { %v251_v35 = vsel %vm250_vm5, %v245_v31, %v248_v33  ;;  %v874_v36 = vld [vmem:[#allocation3 + $0x20] sm:$0xff] }
  0xa0   : > { %v252_v34 = vsel %vm250_vm5, %v247_v30, %v249_v32  ;;  %255 = vst [vmem:[#allocation3 + $0x8] sm:$0xf] %v251_v35  ;;  %374 = vmatpush.bf16.msra.mxu0 %v874_v36  ;;  %v873_v37 = vld [vmem:[#allocation3 + $0x18] sm:$0xff] }
  0xa1   : > { %256 = vst [vmem:[#allocation3 + $0xc] sm:$0xf] %v252_v34 }
  0xa4   : > { %375 = vmatpush.bf16.msra.mxu0 %v873_v37  ;;  %v330_v47 = vpop.permute.xlu0 %329 }
  0xa8   : > { %376 = vmatpush.bf16.msra.mxu0 %v872_v38  ;;  %v871_v39 = vld [vmem:[#allocation3 + $0x8] sm:$0xff] }
  0xac   : > { %377 = vmatpush.bf16.msra.mxu0 %v871_v39 }
  0xb0   : > { %378 = vmatpush.bf16.msra.mxu0 %v870_v40 }
  0xb3   : > { %806 = vmatmul.msk.bf16.vlgmr.msra.gmra.mxu0 %vm367_vm6, %v869_v41 }
 0x130   : > { %v380_v43 = vpop.f32.mrf.mxu0 }
 0x131   : > { %v381_v44 = vadd.f32 %v380_v43, %v325_v42 }
 0x133   : > { %v385_v45 = vmax.f32 %v381_v44, 0.0  ;;  %v838_v44 = vld [vmem:[%s1106_s2 + $0x20] sm:$0xff] }
 0x135   : > { %v1018_v46 = vadd.f32 %v385_v45, %v979_v1  ;;  %v839_v45 = vld [vmem:[%s1106_s2 + $0x28] sm:$0xff] }
 0x137   : > { %v389_v48 = vpack.c.bf16 %v1018_v46, %v1018_v46 }
 0x138   : > { %v382_v49 = vpop.f32.mrf.mxu0 }
 0x139   : > { %391 = vst.msk [vmem:[#allocation2 + $0x4] sm:$0xf] %vm235_vm1, %v389_v48  ;;  %v383_v50 = vadd.f32 %v382_v49, %v330_v47 }
 0x13b   : > { %v386_v51 = vmax.f32 %v383_v50, 0.0 }
 0x13d   : > { %v1024_v52 = vadd.f32 %v386_v51, %v981_v2 }
 0x13f   : > { %v390_v53 = vpack.c.bf16 %v1024_v52, %v1024_v52  ;;  %v895_v54 = vpack.c.bf16 %v1024_v52, %v1018_v46 }
 0x140   : > { %v445_v55 = vld [vmem:[#allocation2 + $0x4] sm:$0xff] }
 0x141   : > { %392 = vst.msk [vmem:[#allocation2 + $0x10] sm:$0xf] %vm235_vm1, %v390_v53  ;;  %449 = vrot.lane.b32.xlu1 %v445_v55, %s933_s9  ;;  %416 = vrot.lane.b32.xlu0 %v445_v55, %s933_s9  ;;  %v429_v56 = vld [vmem:[#allocation2] sm:$0xff] }
 0x142   : > { %896 = vst [vmem:[#allocation3] sm:$0xff] %v895_v54  }
 0x148   : > { %v446_v57 = vld [vmem:[#allocation2 + $0x10] sm:$0xff] }
 0x149   : > { %v396_v58 = vld [vmem:[#allocation2 + $0xc] sm:$0xff]  ;;  %433 = vrot.lane.b32.xlu1 %v429_v56, %s934_s10  ;;  %451 = vrot.lane.b32.xlu2 %v446_v57, %s933_s9  ;;  %v876_v25 = vld [vmem:[#allocation3] sm:$0xff] }
 0x14a   : > { %401 = vrot.lane.b32.xlu0 %v396_v58, %s934_s10 }
 0x151   : > { %435 = vrot.lane.b32.xlu2 %v396_v58, %s934_s10  ;;  %418 = vrot.lane.b32.xlu1 %v446_v57, %s933_s9 }
 0x159   : > { %399 = vrot.lane.b32.xlu2 %v429_v56, %s934_s10  ;;  %479 = vperm.xlu1 %919, %v809_v12   ;;  %v881_v12 = vld [vmem:[%s1105_s1 + $0x10] sm:$0xff] }
 0x161   : > { %484 = vperm.xlu2 %917, %v810_v59  }
 0x1a3   : > { %v452_v60 = vpop.permute.xlu2 %451 }
 0x1a4   : > { %v454_v61 = vrot.slane %v452_v60, 4 }
 0x1a6   : > { %v456_v62 = vsel %vm422_vm7, %v452_v60, %v454_v61 }
 0x1a7   : > { %460 = vst [vmem:[#allocation3 + $0x24] sm:$0xf] %v456_v62 }
 0x1ab   : > { %v436_v63 = vpop.permute.xlu2 %435 }
 0x1ac   : > { %v438_v0 = vrot.slane %v436_v63, 4 }
 0x1ae   : > { %v440_v1 = vsel %vm405_vm8, %v436_v63, %v438_v0 }
 0x1af   : > { %444 = vst [vmem:[#allocation3 + $0x1c] sm:$0xf] %v440_v1 }
 0x1b3   : > { %v450_v2 = vpop.permute.xlu1 %449  ;;  %v400_v3 = vpop.permute.xlu2 %399 }
 0x1b4   : > { %v453_v4 = vrot.slane %v450_v2, 4  ;;  %v403_v5 = vrot.slane %v400_v3, 4  ;;  %v417_v6 = vpop.permute.xlu0 %416 }
 0x1b5   : > { %v420_v7 = vrot.slane %v417_v6, 4 }
 0x1b6   : > { %v455_v8 = vsel %vm422_vm7, %v450_v2, %v453_v4  ;;  %v406_v9 = vsel %vm405_vm8, %v400_v3, %v403_v5 }
 0x1b7   : > { %459 = vst [vmem:[#allocation3 + $0x20] sm:$0xf] %v455_v8  ;;  %v423_v10 = vsel %vm422_vm7, %v417_v6, %v420_v7 }
 0x1b8   : > { %410 = vst [vmem:[#allocation3 + $0x8] sm:$0xf] %v406_v9 }
 0x1b9   : > { %427 = vst [vmem:[#allocation3 + $0x10] sm:$0xf] %v423_v10 }
 0x1bb   : > { %v434_v11 = vpop.permute.xlu1 %433  ;;  %v485_v33 = vpop.permute.xlu2 %484 }
 0x1bc   : > { %v437_v13 = vrot.slane %v434_v11, 4  ;;  %v402_v14 = vpop.permute.xlu0 %401 }
 0x1bd   : > { %v404_v15 = vrot.slane %v402_v14, 4 }
 0x1be   : > { %v439_v16 = vsel %vm405_vm8, %v434_v11, %v437_v13  ;;  %v880_v17 = vld [vmem:[#allocation3 + $0x20] sm:$0xff] }
 0x1bf   : > { %443 = vst [vmem:[#allocation3 + $0x18] sm:$0xf] %v439_v16  ;;  %v407_v18 = vsel %vm405_vm8, %v402_v14, %v404_v15  ;;  %528 = vmatpush.bf16.msra.mxu1 %v880_v17 }
 0x1c0   : > { %411 = vst [vmem:[#allocation3 + $0xc] sm:$0xf] %v407_v18 }
 0x1c3   : > { %v419_v19 = vpop.permute.xlu1 %418 }
 0x1c4   : > { %v421_v20 = vrot.slane %v419_v19, 4 }
 0x1c6   : > { %v424_v21 = vsel %vm422_vm7, %v419_v19, %v421_v20  ;;  %v879_v22 = vld [vmem:[#allocation3 + $0x18] sm:$0xff] }
 0x1c7   : > { %428 = vst [vmem:[#allocation3 + $0x14] sm:$0xf] %v424_v21  ;;  %529 = vmatpush.bf16.msra.mxu1 %v879_v22  ;;  %v877_v24 = vld [vmem:[#allocation3 + $0x8] sm:$0xff] }
 0x1cb   : > { %v480_v27 = vpop.permute.xlu1 %479 }
 0x1ce   : > { %v878_v23 = vld [vmem:[#allocation3 + $0x10] sm:$0xff] }
 0x1cf   : > { %530 = vmatpush.bf16.msra.mxu1 %v878_v23 }
 0x1d3   : > { %531 = vmatpush.bf16.msra.mxu1 %v877_v24  ;;  %v695_v24 = vld [vmem:[%s1107_s3] sm:$0xf] }
 0x1d7   : > { %532 = vmatpush.bf16.msra.mxu1 %v876_v25 }
 0x1da   : > { %835 = vmatmul.msk.bf16.vlgmr.msra.gmra.mxu1 %vm367_vm6, %v875_v26 }
 0x257   : > { %v534_v28 = vpop.f32.mrf.mxu1 }
 0x258   : > { %v535_v29 = vadd.f32 %v534_v28, %v480_v27 }
 0x25a   : > { %v539_v30 = vmax.f32 %v535_v29, 0.0 }
 0x25c   : > { %v1050_v31 = vadd.f32 %v539_v30, %v1018_v46  ;;  %v697_v46 = vld [vmem:[%s1108_s4] sm:$0xff] }
 0x25e   : > { %v543_v32 = vpack.c.bf16 %v1050_v31, %v1050_v31 }
 0x25f   : > { %v536_v34 = vpop.f32.mrf.mxu1 }
 0x260   : > { %545 = vst.msk [vmem:[#allocation2 + $0x4] sm:$0xf] %vm235_vm1, %v543_v32  ;;  %v537_v35 = vadd.f32 %v536_v34, %v485_v33 }
 0x262   : > { %v540_v36 = vmax.f32 %v537_v35, 0.0 }
 0x264   : > { %v1056_v37 = vadd.f32 %v540_v36, %v1024_v52 }
 0x266   : > { %v544_v38 = vpack.c.bf16 %v1056_v37, %v1056_v37  ;;  %v900_v39 = vpack.c.bf16 %v1056_v37, %v1050_v31 }
 0x267   : > { %v597_v40 = vld [vmem:[#allocation2 + $0x4] sm:$0xff] }
 0x268   : > { %v581_v41 = vld [vmem:[#allocation2] sm:$0xff]  ;;  %901 = vst [vmem:[#allocation3] sm:$0xff] %v900_v39   ;;  %601 = vrot.lane.b32.xlu0 %v597_v40, %s931_s26 }
 0x269   : > { %585 = vrot.lane.b32.xlu2 %v581_v41, %s932_s27  ;;  %546 = vst.msk [vmem:[#allocation2 + $0x10] sm:$0xf] %vm235_vm1, %v544_v38 }
 0x26f   : > { %v882_v11 = vld [vmem:[#allocation3] sm:$0xff] }
 0x270   : > { %v598_v42 = vld [vmem:[#allocation2 + $0x10] sm:$0xff] }
 0x271   : > { %v582_v43 = vld [vmem:[#allocation2 + $0xc] sm:$0xff]  ;;  %603 = vrot.lane.b32.xlu1 %v598_v42, %s931_s26  ;;  %571 = vrot.lane.b32.xlu2 %v598_v42, %s929_s24 }
 0x272   : > { %587 = vrot.lane.b32.xlu0 %v582_v43, %s932_s27 }
 0x279   : > { %569 = vrot.lane.b32.xlu1 %v597_v40, %s929_s24  ;;  %631 = vperm.xlu2 %917, %v838_v44  }
 0x27a   : > { %553 = vrot.lane.b32.xlu0 %v581_v41, %s930_s25 }
 0x281   : > { %555 = vrot.lane.b32.xlu1 %v582_v43, %s930_s25 }
 0x282   : > { %636 = vperm.xlu0 %918, %v839_v45  }
 0x289   : > { %700 = vperm.xlu1 %919, %v697_v46  }
 0x2c3   : > { %v586_v47 = vpop.permute.xlu2 %585 }
 0x2c4   : > { %v589_v48 = vrot.slane %v586_v47, 4 }
 0x2c6   : > { %v591_v49 = vsel %vm250_vm5, %v586_v47, %v589_v48 }
 0x2c7   : > { %595 = vst [vmem:[#allocation3 + $0x18] sm:$0xf] %v591_v49 }
 0x2cb   : > { %v572_v50 = vpop.permute.xlu2 %571 }
 0x2cc   : > { %v574_v51 = vrot.slane %v572_v50, 4 }
 0x2ce   : > { %v576_v52 = vsel %vm301_vm3, %v572_v50, %v574_v51 }
 0x2cf   : > { %580 = vst [vmem:[#allocation3 + $0x14] sm:$0xf] %v576_v52 }
 0x2d3   : > { %v632_v14 = vpop.permute.xlu2 %631 }
 0x2da   : > { %v602_v53 = vpop.permute.xlu0 %601 }
 0x2db   : > { %v605_v54 = vrot.slane %v602_v53, 4 }
 0x2dd   : > { %v607_v55 = vsel %vm267_vm2, %v602_v53, %v605_v54 }
 0x2de   : > { %611 = vst [vmem:[#allocation3 + $0x20] sm:$0xf] %v607_v55 }
 0x2e3   : > { %v604_v56 = vpop.permute.xlu1 %603 }
 0x2e4   : > { %v588_v57 = vpop.permute.xlu0 %587  ;;  %v606_v58 = vrot.slane %v604_v56, 4 }
 0x2e5   : > { %v590_v59 = vrot.slane %v588_v57, 4 }
 0x2e6   : > { %v608_v60 = vsel %vm267_vm2, %v604_v56, %v606_v58 }
 0x2e7   : > { %v592_v61 = vsel %vm250_vm5, %v588_v57, %v590_v59  ;;  %612 = vst [vmem:[#allocation3 + $0x24] sm:$0xf] %v608_v60 }
 0x2e8   : > { %596 = vst [vmem:[#allocation3 + $0x1c] sm:$0xf] %v592_v61 }
 0x2eb   : > { %v570_v62 = vpop.permute.xlu1 %569 }
 0x2ec   : > { %v554_v63 = vpop.permute.xlu0 %553  ;;  %v573_v0 = vrot.slane %v570_v62, 4 }
 0x2ed   : > { %v557_v1 = vrot.slane %v554_v63, 4 }
 0x2ee   : > { %v575_v2 = vsel %vm301_vm3, %v570_v62, %v573_v0  ;;  %v886_v4 = vld [vmem:[#allocation3 + $0x20] sm:$0xff] }
 0x2ef   : > { %v559_v3 = vsel %vm284_vm4, %v554_v63, %v557_v1  ;;  %579 = vst [vmem:[#allocation3 + $0x10] sm:$0xf] %v575_v2  ;;  %680 = vmatpush.bf16.msra.mxu2 %v886_v4  ;;  %v885_v5 = vld [vmem:[#allocation3 + $0x18] sm:$0xff] }
 0x2f0   : > { %563 = vst [vmem:[#allocation3 + $0x8] sm:$0xf] %v559_v3 }
 0x2f3   : > { %v556_v6 = vpop.permute.xlu1 %555  ;;  %681 = vmatpush.bf16.msra.mxu2 %v885_v5 }
 0x2f4   : > { %v558_v7 = vrot.slane %v556_v6, 4  ;;  %v637_v16 = vpop.permute.xlu0 %636 }
 0x2f6   : > { %v560_v8 = vsel %vm284_vm4, %v556_v6, %v558_v7  ;;  %v884_v9 = vld [vmem:[#allocation3 + $0x10] sm:$0xff] }
 0x2f7   : > { %564 = vst [vmem:[#allocation3 + $0xc] sm:$0xf] %v560_v8  ;;  %682 = vmatpush.bf16.msra.mxu2 %v884_v9 }
 0x2fb   : > { %v701_v25 = vpop.permute.xlu1 %700 }
 0x2fe   : > { %v883_v10 = vld [vmem:[#allocation3 + $0x8] sm:$0xff] }
 0x2ff   : > { %683 = vmatpush.bf16.msra.mxu2 %v883_v10 }
 0x303   : > { %684 = vmatpush.bf16.msra.mxu2 %v882_v11 }
 0x306   : > { %864 = vmatmul.msk.bf16.vlgmr.msra.gmra.mxu2 %vm367_vm6, %v881_v12 }
 0x389   : > { %v686_v13 = vpop.f32.mrf.mxu2 }
 0x38a   : > { %v687_v15 = vadd.f32 %v686_v13, %v632_v14 }
 0x38c   : > { %v691_v18 = vmax.f32 %v687_v15, 0.0 }
 0x38e   : > { %v693_v21 = vadd.f32 %v691_v18, %v1050_v31 }
 0x391   : > { %v688_v17 = vpop.f32.mrf.mxu2 }
 0x392   : > { %v689_v19 = vadd.f32 %v688_v17, %v637_v16 }
 0x394   : > { %v692_v20 = vmax.f32 %v689_v19, 0.0 }
 0x396   : > { %v694_v22 = vadd.f32 %v692_v20, %v1056_v37 }
 0x398   : > { %v696_v23 = vpack.c.bf16 %v694_v22, %v693_v21 }
 0x39a   : > { %714 = vmatpush.bf16.msra.mxu3 %v696_v23 }
 0x39d   : > { %865 = vmatmul.msk.bf16.vlgmr.msra.gmra.mxu3 %vm703_vm9, %v695_v24 }
 0x420   : > { %v716_v26 = vpop.f32.mrf.mxu3 }
 0x421   : > { %v717_v27 = vadd.f32 %v716_v26, %v701_v25 }
 0x423   : > { %720 = vst [vmem:[%s222_s7] sm:$0xff] %v717_v27 }
 0x428   : > { %v718_v28 = vpop.f32.mrf.mxu3 }
 0x429 PF: > { %s15_s18 = sadd.s32 1, %s926_s18  }
 0x42a   : > { %p12_p4 = scmp.ge.s32.totalorder %s15_s18, 4  }
 0x42c   :  { %14 = sbr.rel (!%p12_p4) target bundleno = 1 (0x1), region = 74 }

</bundles_post_ra>
